<compile_context>
chip_gen: v5e
topology: v5e:2x2
jax: 0.10.0
libtpu: 0.0.40
codegen_flags: <defaults>
</compile_context>

<pallas_src>
import jax
import jax.numpy as jnp
from jax.experimental import pallas as pl
from jax.experimental.pallas import tpu as pltpu

_LANE, _SUB = 128, 8
_RHS_RESIDENT_BYTES = 4 * 1024 * 1024   # keep the full RHS VMEM-resident below this
_LHS_TILE_BYTES = 8 * 1024 * 1024       # ... as long as the matching LHS row tile fits


# ---------------------------------------------------------------------------
# small helpers
# ---------------------------------------------------------------------------

def _ceil_to(v, m):
    return -(-v // m) * m


def _pad_rows(d):
    # sublane (row) dim: 8-granular, 128-granular once large (nicer row tiles)
    return _ceil_to(d, _SUB) if d <= 512 else _ceil_to(d, _LANE)


def _pad2(x, rows, cols):
    return jnp.pad(x, ((0, rows - x.shape[0]), (0, cols - x.shape[1])))


def _pick_tile(dim, target, align):
    """Largest multiple of `align` that divides `dim` and is <= `target`."""
    if dim <= target:
        return dim
    t = (target // align) * align
    while t >= align:
        if dim % t == 0:
            return t
        t -= align
    return dim


def _hw_tile_config():
    """Per-generation tile targets / VMEM limit (perf review):
       * v5e / v6e (128 MiB physical VMEM): fatter 512/512/1024-class tiles,
         64 MiB scoped limit -> fewer grid steps on mem-bound shapes.
       * v7x (64 MiB physical) or unknown: ~256/512/512 (~3 MiB working set),
         32 MiB limit; v7x wins come from HBM BW + 2 TCs, not bigger tiles.
    """
    try:
        vmem = int(pltpu.get_tpu_info().vmem_capacity_bytes)
    except Exception:            # info unavailable -> conservative (v7x-safe)
        vmem = 0
    if vmem >= 100 * 1024 * 1024:
        return dict(tm=512, tn=512, tk=1024, vmem_limit=64 * 1024 * 1024)
    return dict(tm=256, tn=512, tk=512, vmem_limit=32 * 1024 * 1024)


# ---------------------------------------------------------------------------
# Pallas call 1: fused dual-head projection  (ctx -> bf16, mask -> f32 + bias)
# ---------------------------------------------------------------------------

def _proj_kernel_1k(x_ref, wc_ref, wm_ref, bm_ref, octx_ref, omask_ref):
    # single K step: no accumulator scratch, no init/finalize tile copies
    xw_c = jnp.dot(x_ref[...], wc_ref[...], preferred_element_type=jnp.float32)
    xw_m = jnp.dot(x_ref[...], wm_ref[...], preferred_element_type=jnp.float32)
    octx_ref[...] = xw_c.astype(octx_ref.dtype)                     # bf16 ctx head
    omask_ref[...] = (xw_m + bm_ref[...]).astype(omask_ref.dtype)   # f32 mask head


def _proj_kernel_acc(x_ref, wc_ref, wm_ref, bm_ref, octx_ref, omask_ref,
                     acc_c, acc_m):
    k = pl.program_id(1)

    @pl.when(k == 0)
    def _init():
        acc_c[...] = jnp.zeros_like(acc_c)
        acc_m[...] = jnp.zeros_like(acc_m)

    acc_c[...] += jnp.dot(x_ref[...], wc_ref[...], preferred_element_type=jnp.float32)
    acc_m[...] += jnp.dot(x_ref[...], wm_ref[...], preferred_element_type=jnp.float32)

    @pl.when(k == pl.num_programs(1) - 1)
    def _finalize():
        octx_ref[...] = acc_c[...].astype(octx_ref.dtype)
        omask_ref[...] = (acc_m[...] + bm_ref[...]).astype(omask_ref.dtype)


def fused_projection(x, w_ctx, w_mask, b_mask, cfg):
    """One pass over shared X for both heads.

    Returns (xw_ctx bf16 (M,H) -- NO bias, consumed by the A @ (XW) call,
             mask   f32  (M,H) -- X @ W_mask + b_mask).
    """
    M, K = x.shape
    _, H = w_ctx.shape
    tm = _pick_tile(M, cfg["tm"], _SUB)
    tk = _pick_tile(K, cfg["tk"], _LANE)
    out_shape = (jax.ShapeDtypeStruct((M, H), jnp.bfloat16),
                 jax.ShapeDtypeStruct((M, H), jnp.float32))

    if tk == K:        # whole contraction in one step
        return pl.pallas_call(
            _proj_kernel_1k,
            out_shape=out_shape,
            grid_spec=pltpu.PrefetchScalarGridSpec(
                num_scalar_prefetch=0,
                grid=(M // tm,),
                in_specs=[
                    pl.BlockSpec((tm, K), lambda i: (i, 0)),
                    pl.BlockSpec((K, H), lambda i: (0, 0)),   # weights stay resident
                    pl.BlockSpec((K, H), lambda i: (0, 0)),
                    pl.BlockSpec((1, H), lambda i: (0, 0)),
                ],
                out_specs=[pl.BlockSpec((tm, H), lambda i: (i, 0)),
                           pl.BlockSpec((tm, H), lambda i: (i, 0))],
            ),
            compiler_params=pltpu.CompilerParams(
                dimension_semantics=("parallel",),
                vmem_limit_bytes=cfg["vmem_limit"]),
        )(x, w_ctx, w_mask, b_mask)

    return pl.pallas_call(
        _proj_kernel_acc,
        out_shape=out_shape,
        grid_spec=pltpu.PrefetchScalarGridSpec(
            num_scalar_prefetch=0,
            grid=(M // tm, K // tk),
            in_specs=[
                pl.BlockSpec((tm, tk), lambda i, k: (i, k)),
                pl.BlockSpec((tk, H), lambda i, k: (k, 0)),
                pl.BlockSpec((tk, H), lambda i, k: (k, 0)),
                pl.BlockSpec((1, H), lambda i, k: (0, 0)),
            ],
            out_specs=[pl.BlockSpec((tm, H), lambda i, k: (i, 0)),
                       pl.BlockSpec((tm, H), lambda i, k: (i, 0))],
            scratch_shapes=[pltpu.VMEM((tm, H), jnp.float32),
                            pltpu.VMEM((tm, H), jnp.float32)],
        ),
        compiler_params=pltpu.CompilerParams(
            dimension_semantics=("parallel", "arbitrary"),
            vmem_limit_bytes=cfg["vmem_limit"]),
    )(x, w_ctx, w_mask, b_mask)


# ---------------------------------------------------------------------------
# Pallas call 2: tiled matmul + bias   out = x @ w + b
# ---------------------------------------------------------------------------

def _mm_bias_1k_kernel(x_ref, w_ref, b_ref, o_ref):
    # K fits one tile: no accumulator, bias fused into the single store
    o_ref[...] = (jnp.dot(x_ref[...], w_ref[...],
                          preferred_element_type=jnp.float32)
                  + b_ref[...]).astype(o_ref.dtype)


def _mm_bias_acc_kernel(x_ref, w_ref, b_ref, o_ref):
    # f32 output tile doubles as the accumulator: no scratch, no finalize copy
    k = pl.program_id(2)

    @pl.when(k == 0)
    def _init():
        o_ref[...] = jnp.zeros_like(o_ref)

    o_ref[...] += jnp.dot(x_ref[...], w_ref[...], preferred_element_type=jnp.float32)

    @pl.when(k == pl.num_programs(2) - 1)
    def _finalize():
        o_ref[...] += b_ref[...]


def matmul_bias(x, w, b, cfg, *, out_dtype=jnp.float32):
    """Tiled, pipelined (x @ w) + b. x:(M,K), w:(K,N), b:(1,N) f32 -> (M,N)."""
    M, K = x.shape
    K2, N = w.shape
    assert K == K2 and b.shape == (1, N)

    tm = _pick_tile(M, cfg["tm"], _SUB)
    tn = _pick_tile(N, cfg["tn"], _LANE)
    tk = _pick_tile(K, cfg["tk"], _LANE)
    # Keep the whole RHS VMEM-resident (constant-index full-extent spec) when it
    # and the matching LHS row tile are small: DMA'd once, reused for every row
    # tile of x.
    if (K * N * w.dtype.itemsize <= _RHS_RESIDENT_BYTES
            and tm * K * x.dtype.itemsize <= _LHS_TILE_BYTES):
        tk, tn = K, N

    flops = 2 * M * N * K
    bytes_accessed = int(x.size * x.dtype.itemsize + w.size * w.dtype.itemsize
                         + b.size * b.dtype.itemsize
                         + M * N * jnp.dtype(out_dtype).itemsize)
    cost = pl.CostEstimate(flops=flops, transcendentals=0,
                           bytes_accessed=bytes_accessed)

    if tk == K:
        return pl.pallas_call(
            _mm_bias_1k_kernel,
            out_shape=jax.ShapeDtypeStruct((M, N), out_dtype),
            grid_spec=pltpu.PrefetchScalarGridSpec(
                num_scalar_prefetch=0,
                grid=(M // tm, N // tn),
                in_specs=[pl.BlockSpec((tm, K), lambda i, j: (i, 0)),
                          pl.BlockSpec((K, tn), lambda i, j: (0, j)),
                          pl.BlockSpec((1, tn), lambda i, j: (0, j))],
                out_specs=pl.BlockSpec((tm, tn), lambda i, j: (i, j)),
            ),
            compiler_params=pltpu.CompilerParams(
                dimension_semantics=("parallel", "parallel"),
                vmem_limit_bytes=cfg["vmem_limit"]),
            cost_estimate=cost,
        )(x, w, b)

    assert jnp.dtype(out_dtype) == jnp.float32, (
        "multi-K-step path accumulates directly into the (f32) output tile")
    return pl.pallas_call(
        _mm_bias_acc_kernel,
        out_shape=jax.ShapeDtypeStruct((M, N), out_dtype),
        grid_spec=pltpu.PrefetchScalarGridSpec(
            num_scalar_prefetch=0,
            grid=(M // tm, N // tn, K // tk),
            in_specs=[pl.BlockSpec((tm, tk), lambda i, j, k: (i, k)),
                      pl.BlockSpec((tk, tn), lambda i, j, k: (k, j)),
                      pl.BlockSpec((1, tn), lambda i, j, k: (0, j))],
            out_specs=pl.BlockSpec((tm, tn), lambda i, j, k: (i, j)),
        ),
        compiler_params=pltpu.CompilerParams(
            dimension_semantics=("parallel", "parallel", "arbitrary"),
            vmem_limit_bytes=cfg["vmem_limit"]),
        cost_estimate=cost,
    )(x, w, b)


# ---------------------------------------------------------------------------
# forward (glue + 2 pallas_calls)
# ---------------------------------------------------------------------------

def graph_prompt_structure_forward(params, feature, prototype, base_indices,
                                    base_values, unique_list, num_nodes, label_num):
    """Mirrors graph_prompt_structure.forward + pre_train().

    Returns (pred_mask, pred_context, pro_pred_mask, pro_pred_context, weight).
    TODO(synk): pre_train_mask / pre_train_context are opaque external modules;
    instantiated here as a linear head and a 1-layer GCN (A@X)@W+b.
    """
    N, L = num_nodes, label_num
    F_dim = feature.shape[1]
    H = params["w_ctx"].shape[1]
    NL = N + L

    cfg = _hw_tile_config()

    # F.softmax(weight): PyTorch's deprecated no-dim default is dim=1 for 2-D
    # tensors, i.e. axis=-1.  (U, L) is lane-sparse -> leave it to XLA.
    weight = params["weight"]
    soft_w = jax.nn.softmax(weight, axis=-1)

    # ---- padded shapes: lanes 128-granular, rows 8-granular ----
    Np = _pad_rows(N)
    NLp = _ceil_to(NL, _LANE)        # contraction dim of call 2 -> lane aligned
    Fp = _ceil_to(F_dim, _LANE)
    Hp = _ceil_to(H, _LANE)

    # ---- single-pass extended-adjacency build (one buffer, one bf16 cast) ----
    # torch sparse_coo_tensor(...).coalesce() sums duplicates == scatter-ADD.
    # Prompt edges only hit the L label columns (cols N..N+L-1); prototype rows
    # (>= N) have no incoming edges so they never appear as rows here.
    # soft_w rows are indexed by unique_list order (weight = _weight[unique_list]
    # in the original), which this scatter preserves for any rate < 1.0.
    a_pad = jnp.zeros((Np, NLp), jnp.float32)
    a_pad = a_pad.at[base_indices[0], base_indices[1]].add(base_values)
    a_pad = a_pad.at[unique_list[:, None], N + jnp.arange(L)[None, :]].add(soft_w)
    a_pad = a_pad.astype(jnp.bfloat16)

    # ---- X_ext = [feature; prototype], padded & cast once ----
    x_pad = jnp.zeros((NLp, Fp), jnp.bfloat16)
    x_pad = x_pad.at[:N, :F_dim].set(feature.astype(jnp.bfloat16))
    x_pad = x_pad.at[N:NL, :F_dim].set(prototype.astype(jnp.bfloat16))

    w_ctx = _pad2(params["w_ctx"], Fp, Hp).astype(jnp.bfloat16)
    w_mask = _pad2(params["w_mask"], Fp, Hp).astype(jnp.bfloat16)
    b_mask = _pad2(params["b_mask"], 1, Hp)
    b_ctx = _pad2(params["b_ctx"], 1, Hp)

    # Pallas call 1: fused projection of BOTH heads over shared X.
    #   ctx head -> bf16 (no bias; b_ctx is added after the adjacency matmul)
    #   mask head -> f32 with b_mask fused
    xw_ctx, pred_mask_full = fused_projection(x_pad, w_ctx, w_mask, b_mask, cfg)
    pred_mask = pred_mask_full[:N, :H]                               # (N, H) f32

    # Pallas call 2: message passing reordered as A @ (X @ W_ctx) + b_ctx.
    ctx_top = matmul_bias(a_pad, xw_ctx, b_ctx, cfg, out_dtype=jnp.float32)

    # Prototype rows have no incoming edges -> (A@X)[N:] == 0 -> context = bias.
    ctx_bottom = jnp.broadcast_to(params["b_ctx"], (L, H))
    pred_context = jnp.concatenate([ctx_top[:N, :H], ctx_bottom], axis=0)  # (N+L, H)

    # As in the original pre_train(): pred_mask is computed over `features`
    # (graph nodes only) and its LAST label_num rows are sliced — kept verbatim.
    pro_pred_mask = pred_mask[-L:]
    pro_pred_context = pred_context[-L:]
    return pred_mask, pred_context, pro_pred_mask, pro_pred_context, weight


# ---------------------------------------------------------------------------
# driver
# ---------------------------------------------------------------------------

if __name__ == "__main__":
    key = jax.random.PRNGKey(0)
    N, L, F, H = 16, 4, 32, 32          # num_nodes, label_num, feat dim, hidden dim
    k = jax.random.split(key, 8)

    feature = jax.random.normal(k[0], (N, F), jnp.float32)       # self.feature
    prototype = jax.random.normal(k[1], (L, F), jnp.float32)     # self.prototype

    # deterministic sparse adjacency: self-loops + directed ring
    src = jnp.arange(N)
    ring = (src + 1) % N
    base_indices = jnp.stack(
        [jnp.concatenate([src, src]), jnp.concatenate([src, ring])])   # (2, 2N)
    base_values = jnp.ones((2 * N,), jnp.float32)

    # unique_list from reset_parameters() (rate=1.0 -> every node kept)
    unique_list = jnp.arange(N)

    params = {
        "weight": jax.random.normal(k[2], (N, L), jnp.float32),          # prompt weight
        "w_mask": jax.random.normal(k[3], (F, H), jnp.float32) * 0.1,
        "b_mask": jax.random.normal(k[4], (1, H), jnp.float32) * 0.1,
        "w_ctx": jax.random.normal(k[5], (F, H), jnp.float32) * 0.1,
        "b_ctx": jax.random.normal(k[6], (1, H), jnp.float32) * 0.1,
    }

    fwd = jax.jit(graph_prompt_structure_forward, static_argnums=(6, 7))
    outs = fwd(params, feature, prototype, base_indices, base_values, unique_list, N, L)
    jax.block_until_ready(outs)
    pred_mask, pred_context, pro_pred_mask, pro_pred_context, weight = outs

    assert pred_mask.shape == (N, H)
    assert pred_context.shape == (N + L, H)
    assert pro_pred_mask.shape == (L, H)
    assert pro_pred_context.shape == (L, H)
    assert weight.shape == (N, L)

    # pure-JAX f32 reference of the same forward (loose tolerance: kernels feed
    # the MXU bf16 copies of A/X/W but accumulate in f32).
    soft_w = jax.nn.softmax(params["weight"], axis=-1)
    rows = jnp.concatenate([base_indices[0], jnp.tile(unique_list, L)])
    cols = jnp.concatenate([base_indices[1], N + jnp.repeat(jnp.arange(L), N)])
    vals = jnp.concatenate([base_values] + [soft_w[:, i] for i in range(L)])
    adj = jnp.zeros((N + L, N + L), jnp.float32).at[rows, cols].add(vals)
    xf = jnp.concatenate([feature, prototype], axis=0)
    ref_mask = feature @ params["w_mask"] + params["b_mask"]
    ref_ctx = (adj @ xf) @ params["w_ctx"] + params["b_ctx"]
    assert jnp.allclose(pred_mask, ref_mask, atol=1e-1, rtol=1e-1)
    assert jnp.allclose(pred_context, ref_ctx, atol=1e-1, rtol=1e-1)

    print("KERNEL_OK")
</pallas_src>

<mosaic_0001>
module attributes {stable_mosaic.version = 11 : i64} {
  func.func @_proj_kernel_1k(%arg0: i32, %arg1: memref<128x128xbf16, #tpu.memory_space<vmem>>, %arg2: memref<128x128xbf16, #tpu.memory_space<vmem>>, %arg3: memref<128x128xbf16, #tpu.memory_space<vmem>>, %arg4: memref<1x128xf32, #tpu.memory_space<vmem>>, %arg5: memref<128x128xbf16, #tpu.memory_space<vmem>>, %arg6: memref<128x128xf32, #tpu.memory_space<vmem>>) attributes {dimension_semantics = [#tpu.dimension_semantics<parallel>], iteration_bounds = array<i64: 1>, scalar_prefetch = 0 : i64, scratch_operands = 0 : i64, tpu.core_type = #tpu.core_type<tc>, window_params = [{transform_indices = @transform_0, window_bounds = array<i64: 128, 128>}, {pipeline_mode = #tpu.pipeline_mode<synchronous>, transform_indices = @transform_1, window_bounds = array<i64: 128, 128>}, {pipeline_mode = #tpu.pipeline_mode<synchronous>, transform_indices = @transform_2, window_bounds = array<i64: 128, 128>}, {pipeline_mode = #tpu.pipeline_mode<synchronous>, transform_indices = @transform_3, window_bounds = array<i64: 1, 128>}, {transform_indices = @transform_4, window_bounds = array<i64: 128, 128>}, {transform_indices = @transform_5, window_bounds = array<i64: 128, 128>}]} {
    %c0 = arith.constant 0 : index
    %c0_0 = arith.constant 0 : index
    %0 = vector.load %arg1[%c0, %c0_0] : memref<128x128xbf16, #tpu.memory_space<vmem>>, vector<128x128xbf16>
    %c0_1 = arith.constant 0 : index
    %c0_2 = arith.constant 0 : index
    %1 = vector.load %arg2[%c0_1, %c0_2] : memref<128x128xbf16, #tpu.memory_space<vmem>>, vector<128x128xbf16>
    %cst = arith.constant dense<0.000000e+00> : vector<128x128xf32>
    %2 = tpu.matmul %0, %1, %cst {dimension_numbers = #tpu.dot_dimension_numbers<[1], [0], [0], [1], [0, 0, 1, 1], [], []>} : vector<128x128xbf16>, vector<128x128xbf16>, vector<128x128xf32> -> vector<128x128xf32>
    %c0_3 = arith.constant 0 : index
    %c0_4 = arith.constant 0 : index
    %3 = vector.load %arg1[%c0_3, %c0_4] : memref<128x128xbf16, #tpu.memory_space<vmem>>, vector<128x128xbf16>
    %c0_5 = arith.constant 0 : index
    %c0_6 = arith.constant 0 : index
    %4 = vector.load %arg3[%c0_5, %c0_6] : memref<128x128xbf16, #tpu.memory_space<vmem>>, vector<128x128xbf16>
    %cst_7 = arith.constant dense<0.000000e+00> : vector<128x128xf32>
    %5 = tpu.matmul %3, %4, %cst_7 {dimension_numbers = #tpu.dot_dimension_numbers<[1], [0], [0], [1], [0, 0, 1, 1], [], []>} : vector<128x128xbf16>, vector<128x128xbf16>, vector<128x128xf32> -> vector<128x128xf32>
    %6 = arith.truncf %2 : vector<128x128xf32> to vector<128x128xbf16>
    %c0_8 = arith.constant 0 : index
    %c0_9 = arith.constant 0 : index
    %7 = vector.load %arg5[%c0_8, %c0_9] : memref<128x128xbf16, #tpu.memory_space<vmem>>, vector<128x128xbf16>
    tpu.vector_store %arg5[%c0_8, %c0_9], %6 {strides = array<i32>} : memref<128x128xbf16, #tpu.memory_space<vmem>>, vector<128x128xbf16>,
    %c0_10 = arith.constant 0 : index
    %c0_11 = arith.constant 0 : index
    %8 = vector.load %arg4[%c0_10, %c0_11] : memref<1x128xf32, #tpu.memory_space<vmem>>, vector<1x128xf32>
    %9 = vector.broadcast %8 : vector<1x128xf32> to vector<128x128xf32>
    %10 = arith.addf %5, %9 : vector<128x128xf32>
    %c0_12 = arith.constant 0 : index
    %c0_13 = arith.constant 0 : index
    %11 = vector.load %arg6[%c0_12, %c0_13] : memref<128x128xf32, #tpu.memory_space<vmem>>, vector<128x128xf32>
    tpu.vector_store %arg6[%c0_12, %c0_13], %10 {strides = array<i32>} : memref<128x128xf32, #tpu.memory_space<vmem>>, vector<128x128xf32>,
    return
  }
  func.func @transform_0(%arg0: i32) -> (i32, i32) {
    %c0_i32 = arith.constant 0 : i32
    %c0_i32_0 = arith.constant 0 : i32
    return %arg0, %c0_i32 : i32, i32
  }
  func.func @transform_1(%arg0: i32) -> (i32, i32) {
    %c0_i32 = arith.constant 0 : i32
    %c0_i32_0 = arith.constant 0 : i32
    %c0_i32_1 = arith.constant 0 : i32
    return %c0_i32, %c0_i32_0 : i32, i32
  }
  func.func @transform_2(%arg0: i32) -> (i32, i32) {
    %c0_i32 = arith.constant 0 : i32
    %c0_i32_0 = arith.constant 0 : i32
    %c0_i32_1 = arith.constant 0 : i32
    return %c0_i32, %c0_i32_0 : i32, i32
  }
  func.func @transform_3(%arg0: i32) -> (i32, i32) {
    %c0_i32 = arith.constant 0 : i32
    %c0_i32_0 = arith.constant 0 : i32
    %c0_i32_1 = arith.constant 0 : i32
    return %c0_i32, %c0_i32_0 : i32, i32
  }
  func.func @transform_4(%arg0: i32) -> (i32, i32) {
    %c0_i32 = arith.constant 0 : i32
    %c0_i32_0 = arith.constant 0 : i32
    return %arg0, %c0_i32 : i32, i32
  }
  func.func @transform_5(%arg0: i32) -> (i32, i32) {
    %c0_i32 = arith.constant 0 : i32
    %c0_i32_0 = arith.constant 0 : i32
    return %arg0, %c0_i32 : i32, i32
  }
}

module attributes {stable_mosaic.version = 11 : i64} {
  func.func @_mm_bias_1k_kernel(%arg0: i32, %arg1: i32, %arg2: memref<16x128xbf16, #tpu.memory_space<vmem>>, %arg3: memref<128x128xbf16, #tpu.memory_space<vmem>>, %arg4: memref<1x128xf32, #tpu.memory_space<vmem>>, %arg5: memref<16x128xf32, #tpu.memory_space<vmem>>) attributes {dimension_semantics = [#tpu.dimension_semantics<parallel>, #tpu.dimension_semantics<parallel>], iteration_bounds = array<i64: 1, 1>, scalar_prefetch = 0 : i64, scratch_operands = 0 : i64, tpu.core_type = #tpu.core_type<tc>, window_params = [{transform_indices = @transform_0, window_bounds = array<i64: 16, 128>}, {transform_indices = @transform_1, window_bounds = array<i64: 128, 128>}, {transform_indices = @transform_2, window_bounds = array<i64: 1, 128>}, {transform_indices = @transform_3, window_bounds = array<i64: 16, 128>}]} {
    %c0 = arith.constant 0 : index
    %c0_0 = arith.constant 0 : index
    %0 = vector.load %arg2[%c0, %c0_0] : memref<16x128xbf16, #tpu.memory_space<vmem>>, vector<16x128xbf16>
    %c0_1 = arith.constant 0 : index
    %c0_2 = arith.constant 0 : index
    %1 = vector.load %arg3[%c0_1, %c0_2] : memref<128x128xbf16, #tpu.memory_space<vmem>>, vector<128x128xbf16>
    %cst = arith.constant dense<0.000000e+00> : vector<16x128xf32>
    %2 = tpu.matmul %0, %1, %cst {dimension_numbers = #tpu.dot_dimension_numbers<[1], [0], [0], [1], [0, 0, 1, 1], [], []>} : vector<16x128xbf16>, vector<128x128xbf16>, vector<16x128xf32> -> vector<16x128xf32>
    %c0_3 = arith.constant 0 : index
    %c0_4 = arith.constant 0 : index
    %3 = vector.load %arg4[%c0_3, %c0_4] : memref<1x128xf32, #tpu.memory_space<vmem>>, vector<1x128xf32>
    %4 = vector.broadcast %3 : vector<1x128xf32> to vector<16x128xf32>
    %5 = arith.addf %2, %4 : vector<16x128xf32>
    %c0_5 = arith.constant 0 : index
    %c0_6 = arith.constant 0 : index
    %6 = vector.load %arg5[%c0_5, %c0_6] : memref<16x128xf32, #tpu.memory_space<vmem>>, vector<16x128xf32>
    tpu.vector_store %arg5[%c0_5, %c0_6], %5 {strides = array<i32>} : memref<16x128xf32, #tpu.memory_space<vmem>>, vector<16x128xf32>,
    return
  }
  func.func @transform_0(%arg0: i32, %arg1: i32) -> (i32, i32) {
    %c0_i32 = arith.constant 0 : i32
    %c0_i32_0 = arith.constant 0 : i32
    return %arg0, %c0_i32 : i32, i32
  }
  func.func @transform_1(%arg0: i32, %arg1: i32) -> (i32, i32) {
    %c0_i32 = arith.constant 0 : i32
    %c0_i32_0 = arith.constant 0 : i32
    return %c0_i32, %arg1 : i32, i32
  }
  func.func @transform_2(%arg0: i32, %arg1: i32) -> (i32, i32) {
    %c0_i32 = arith.constant 0 : i32
    %c0_i32_0 = arith.constant 0 : i32
    return %c0_i32, %arg1 : i32, i32
  }
  func.func @transform_3(%arg0: i32, %arg1: i32) -> (i32, i32) {
    %c0_i32 = arith.constant 0 : i32
    return %arg0, %arg1 : i32, i32
  }
}

</mosaic_0001>

<bundles_post_ra>
// kernel: graph_prompt_structure_forward.2
= control target key start
LH: loop header
LB: loop body
LE: loop exit
PB: predicated region body
PF: predicated region fallthrough
CT: control target
= control target key end

     0   :  { %s748_s1 = inlined_call_operand.vmem [shape: bf16[128,128], index: 1, kind: input, shape index: {}]   ;;  %s749_s2 = inlined_call_operand.vmem [shape: bf16[128,128], index: 2, kind: input, shape index: {}]   ;;  %s750_s0 = inlined_call_operand.vmem [shape: bf16[128,128], index: 0, kind: input, shape index: {}]   ;;  %s751_s3 = inlined_call_operand.vmem [shape: f32[1,128], index: 3, kind: input, shape index: {}]   ;;  %s752_s5 = inlined_call_operand.vmem [shape: f32[128,128], index: 5, kind: output, shape index: {1}]   ;;  %s753_s4 = inlined_call_operand.vmem [shape: bf16[128,128], index: 4, kind: output, shape index: {0}]  }
   0x1   :  { %v480_v0 = vld [vmem:[%s748_s1 + $0x38] sm:$0xff]  ;;  %v479_v2 = vld [vmem:[%s748_s1 + $0x30] sm:$0xff]  ;;  %v478_v4 = vld [vmem:[%s748_s1 + $0x28] sm:$0xff] }
   0x2   :  { %v488_v1 = vld [vmem:[%s749_s2 + $0x38] sm:$0xff]  ;;  %147 = vmatpush.bf16.msra.mxu0 %v480_v0  ;;  %536 = vmatpush.bf16.msra.mxu2 %v480_v0  ;;  %v487_v3 = vld [vmem:[%s749_s2 + $0x30] sm:$0xff]  ;;  %v486_v5 = vld [vmem:[%s749_s2 + $0x28] sm:$0xff] }
   0x3   :  { %296 = vmatpush.bf16.msra.mxu1 %v488_v1  ;;  %544 = vmatpush.bf16.msra.mxu3 %v488_v1  ;;  %v477_v6 = vld [vmem:[%s748_s1 + $0x20] sm:$0xff]  ;;  %v476_v8 = vld [vmem:[%s748_s1 + $0x18] sm:$0xff]  ;;  %v475_v10 = vld [vmem:[%s748_s1 + $0x10] sm:$0xff] }
   0x4   :  { %v485_v7 = vld [vmem:[%s749_s2 + $0x20] sm:$0xff]  ;;  %v484_v9 = vld [vmem:[%s749_s2 + $0x18] sm:$0xff]  ;;  %v483_v11 = vld [vmem:[%s749_s2 + $0x10] sm:$0xff] }
   0x5   :  { %v474_v12 = vld [vmem:[%s748_s1 + $0x8] sm:$0xff]  ;;  %v473_v14 = vld [vmem:[%s748_s1] sm:$0xff]  ;;  %v467_v20 = vld [vmem:[%s750_s0 + $0x10] sm:$0xff] }
   0x6   :  { %148 = vmatpush.bf16.msra.mxu0 %v479_v2  ;;  %537 = vmatpush.bf16.msra.mxu2 %v479_v2  ;;  %v482_v13 = vld [vmem:[%s749_s2 + $0x8] sm:$0xff]  ;;  %v481_v15 = vld [vmem:[%s749_s2] sm:$0xff]  ;;  %v471_v21 = vld [vmem:[%s750_s0 + $0x30] sm:$0xff] }
   0x7   :  { %297 = vmatpush.bf16.msra.mxu1 %v487_v3  ;;  %545 = vmatpush.bf16.msra.mxu3 %v487_v3  ;;  %v465_v16 = vld [vmem:[%s750_s0] sm:$0xff]  ;;  %v466_v18 = vld [vmem:[%s750_s0 + $0x8] sm:$0xff]  ;;  %v468_v22 = vld [vmem:[%s750_s0 + $0x18] sm:$0xff] }
   0x8   :  { %v469_v17 = vld [vmem:[%s750_s0 + $0x20] sm:$0xff]  ;;  %v470_v19 = vld [vmem:[%s750_s0 + $0x28] sm:$0xff]  ;;  %v472_v23 = vld [vmem:[%s750_s0 + $0x38] sm:$0xff] }
   0x9   :  { %v658_v24 = vld [vmem:[%s751_s3] ss:$0 sm:$0xff] }
   0xa   :  { %149 = vmatpush.bf16.msra.mxu0 %v478_v4  ;;  %538 = vmatpush.bf16.msra.mxu2 %v478_v4 }
   0xb   :  { %298 = vmatpush.bf16.msra.mxu1 %v486_v5  ;;  %546 = vmatpush.bf16.msra.mxu3 %v486_v5 }
   0xe   :  { %150 = vmatpush.bf16.msra.mxu0 %v477_v6  ;;  %539 = vmatpush.bf16.msra.mxu2 %v477_v6 }
   0xf   :  { %299 = vmatpush.bf16.msra.mxu1 %v485_v7  ;;  %547 = vmatpush.bf16.msra.mxu3 %v485_v7 }
  0x12   :  { %151 = vmatpush.bf16.msra.mxu0 %v476_v8  ;;  %540 = vmatpush.bf16.msra.mxu2 %v476_v8 }
  0x13   :  { %300 = vmatpush.bf16.msra.mxu1 %v484_v9  ;;  %548 = vmatpush.bf16.msra.mxu3 %v484_v9 }
  0x16   :  { %152 = vmatpush.bf16.msra.mxu0 %v475_v10  ;;  %541 = vmatpush.bf16.msra.mxu2 %v475_v10 }
  0x17   :  { %301 = vmatpush.bf16.msra.mxu1 %v483_v11  ;;  %549 = vmatpush.bf16.msra.mxu3 %v483_v11 }
  0x1a   :  { %153 = vmatpush.bf16.msra.mxu0 %v474_v12  ;;  %542 = vmatpush.bf16.msra.mxu2 %v474_v12 }
  0x1b   :  { %302 = vmatpush.bf16.msra.mxu1 %v482_v13  ;;  %550 = vmatpush.bf16.msra.mxu3 %v482_v13 }
  0x1e   :  { %154 = vmatpush.bf16.msra.mxu0 %v473_v14  ;;  %543 = vmatpush.bf16.msra.mxu2 %v473_v14 }
  0x1f   :  { %303 = vmatpush.bf16.msra.mxu1 %v481_v15  ;;  %551 = vmatpush.bf16.msra.mxu3 %v481_v15 }
  0x21   :  { %155 = vmatmul.bf16.vlgmr.msra.gmra.mxu0 %v465_v16  ;;  %175 = vmatmul.bf16.vlgmr.msra.gmra.mxu2 %v469_v17 }
  0x22   :  { %304 = vmatmul.bf16.vlgmr.msra.gmra.mxu1 %v465_v16  ;;  %324 = vmatmul.bf16.vlgmr.msra.gmra.mxu3 %v469_v17 }
  0x31   :  { %160 = vmatmul.bf16.gmra.mxu0 %v466_v18  ;;  %180 = vmatmul.bf16.gmra.mxu2 %v470_v19 }
  0x32   :  { %309 = vmatmul.bf16.gmra.mxu1 %v466_v18  ;;  %329 = vmatmul.bf16.gmra.mxu3 %v470_v19 }
  0x41   :  { %165 = vmatmul.bf16.gmra.mxu0 %v467_v20  ;;  %185 = vmatmul.bf16.gmra.mxu2 %v471_v21 }
  0x42   :  { %314 = vmatmul.bf16.gmra.mxu1 %v467_v20  ;;  %334 = vmatmul.bf16.gmra.mxu3 %v471_v21 }
  0x51   :  { %170 = vmatmul.bf16.gmra.mxu0 %v468_v22  ;;  %190 = vmatmul.bf16.gmra.mxu2 %v472_v23 }
  0x52   :  { %319 = vmatmul.bf16.gmra.mxu1 %v468_v22  ;;  %339 = vmatmul.bf16.gmra.mxu3 %v472_v23 }
  0x9e   :  { %v156_v25 = vpop.f32.mrf.mxu0 }
  0x9f   :  { %v305_v26 = vpop.f32.mrf.mxu1 }
  0xa0   :  { %v306_v27 = vadd.f32 %v658_v24, %v305_v26 }
  0xa2   :  { %345 = vst [vmem:[%s752_s5] sm:$0xff] %v306_v27 }
  0xa4   :  { %v176_v28 = vpop.f32.mrf.mxu2 }
  0xa5   :  { %v325_v29 = vpop.f32.mrf.mxu3 }
  0xa6   :  { %v326_v30 = vadd.f32 %v658_v24, %v325_v29  ;;  %v158_v31 = vpop.f32.mrf.mxu0 }
  0xa7   :  { %v492_v32 = vpack.c.bf16 %v158_v31, %v156_v25  ;;  %v307_v33 = vpop.f32.mrf.mxu1 }
  0xa8   :  { %353 = vst [vmem:[%s752_s5 + $0x40] sm:$0xff] %v326_v30  ;;  %v308_v34 = vadd.f32 %v658_v24, %v307_v33 }
  0xa9   :  { %493 = vst [vmem:[%s753_s4] sm:$0xff] %v492_v32  }
  0xaa   :  { %346 = vst [vmem:[%s752_s5 + $0x8] sm:$0xff] %v308_v34 }
  0xac   :  { %v178_v35 = vpop.f32.mrf.mxu2 }
  0xad   :  { %v512_v36 = vpack.c.bf16 %v178_v35, %v176_v28  ;;  %v327_v37 = vpop.f32.mrf.mxu3 }
  0xae   :  { %v328_v38 = vadd.f32 %v658_v24, %v327_v37  ;;  %v161_v39 = vpop.f32.mrf.mxu0 }
  0xaf   :  { %532 = vst [vmem:[%s753_s4 + $0x20] sm:$0xff] %v512_v36   ;;  %v310_v40 = vpop.f32.mrf.mxu1 }
  0xb0   :  { %354 = vst [vmem:[%s752_s5 + $0x48] sm:$0xff] %v328_v38  ;;  %v311_v41 = vadd.f32 %v658_v24, %v310_v40 }
  0xb2   :  { %347 = vst [vmem:[%s752_s5 + $0x10] sm:$0xff] %v311_v41 }
  0xb4   :  { %v181_v42 = vpop.f32.mrf.mxu2 }
  0xb5   :  { %v330_v43 = vpop.f32.mrf.mxu3 }
  0xb6   :  { %v331_v44 = vadd.f32 %v658_v24, %v330_v43  ;;  %v163_v45 = vpop.f32.mrf.mxu0 }
  0xb7   :  { %v497_v46 = vpack.c.bf16 %v163_v45, %v161_v39  ;;  %v312_v47 = vpop.f32.mrf.mxu1 }
  0xb8   :  { %355 = vst [vmem:[%s752_s5 + $0x50] sm:$0xff] %v331_v44  ;;  %v313_v48 = vadd.f32 %v658_v24, %v312_v47 }
  0xb9   :  { %529 = vst [vmem:[%s753_s4 + $0x8] sm:$0xff] %v497_v46  }
  0xba   :  { %348 = vst [vmem:[%s752_s5 + $0x18] sm:$0xff] %v313_v48 }
  0xbc   :  { %v183_v49 = vpop.f32.mrf.mxu2 }
  0xbd   :  { %v517_v50 = vpack.c.bf16 %v183_v49, %v181_v42  ;;  %v332_v51 = vpop.f32.mrf.mxu3 }
  0xbe   :  { %v333_v52 = vadd.f32 %v658_v24, %v332_v51  ;;  %v166_v53 = vpop.f32.mrf.mxu0 }
  0xbf   :  { %533 = vst [vmem:[%s753_s4 + $0x28] sm:$0xff] %v517_v50   ;;  %v315_v54 = vpop.f32.mrf.mxu1 }
  0xc0   :  { %356 = vst [vmem:[%s752_s5 + $0x58] sm:$0xff] %v333_v52  ;;  %v316_v55 = vadd.f32 %v658_v24, %v315_v54 }
  0xc2   :  { %349 = vst [vmem:[%s752_s5 + $0x20] sm:$0xff] %v316_v55 }
  0xc4   :  { %v186_v56 = vpop.f32.mrf.mxu2 }
  0xc5   :  { %v335_v57 = vpop.f32.mrf.mxu3 }
  0xc6   :  { %v336_v58 = vadd.f32 %v658_v24, %v335_v57  ;;  %v168_v59 = vpop.f32.mrf.mxu0 }
  0xc7   :  { %v502_v60 = vpack.c.bf16 %v168_v59, %v166_v53  ;;  %v317_v61 = vpop.f32.mrf.mxu1 }
  0xc8   :  { %357 = vst [vmem:[%s752_s5 + $0x60] sm:$0xff] %v336_v58  ;;  %v318_v62 = vadd.f32 %v658_v24, %v317_v61 }
  0xc9   :  { %530 = vst [vmem:[%s753_s4 + $0x10] sm:$0xff] %v502_v60  }
  0xca   :  { %350 = vst [vmem:[%s752_s5 + $0x28] sm:$0xff] %v318_v62 }
  0xcc   :  { %v188_v63 = vpop.f32.mrf.mxu2 }
  0xcd   :  { %v522_v0 = vpack.c.bf16 %v188_v63, %v186_v56  ;;  %v337_v1 = vpop.f32.mrf.mxu3 }
  0xce   :  { %v338_v2 = vadd.f32 %v658_v24, %v337_v1  ;;  %v171_v3 = vpop.f32.mrf.mxu0 }
  0xcf   :  { %534 = vst [vmem:[%s753_s4 + $0x30] sm:$0xff] %v522_v0   ;;  %v320_v4 = vpop.f32.mrf.mxu1 }
  0xd0   :  { %358 = vst [vmem:[%s752_s5 + $0x68] sm:$0xff] %v338_v2  ;;  %v321_v5 = vadd.f32 %v658_v24, %v320_v4 }
  0xd2   :  { %351 = vst [vmem:[%s752_s5 + $0x30] sm:$0xff] %v321_v5 }
  0xd4   :  { %v191_v6 = vpop.f32.mrf.mxu2 }
  0xd5   :  { %v340_v7 = vpop.f32.mrf.mxu3 }
  0xd6   :  { %v341_v8 = vadd.f32 %v658_v24, %v340_v7  ;;  %v173_v9 = vpop.f32.mrf.mxu0 }
  0xd7   :  { %v507_v10 = vpack.c.bf16 %v173_v9, %v171_v3  ;;  %v322_v11 = vpop.f32.mrf.mxu1 }
  0xd8   :  { %359 = vst [vmem:[%s752_s5 + $0x70] sm:$0xff] %v341_v8  ;;  %v323_v12 = vadd.f32 %v658_v24, %v322_v11 }
  0xd9   :  { %531 = vst [vmem:[%s753_s4 + $0x18] sm:$0xff] %v507_v10  }
  0xda   :  { %352 = vst [vmem:[%s752_s5 + $0x38] sm:$0xff] %v323_v12 }
  0xdc   :  { %v193_v13 = vpop.f32.mrf.mxu2 }
  0xdd   :  { %v527_v14 = vpack.c.bf16 %v193_v13, %v191_v6  ;;  %v342_v15 = vpop.f32.mrf.mxu3 }
  0xde   :  { %v343_v16 = vadd.f32 %v658_v24, %v342_v15 }
  0xdf   :  { %535 = vst [vmem:[%s753_s4 + $0x38] sm:$0xff] %v527_v14  }
  0xe0   :  { %360 = vst [vmem:[%s752_s5 + $0x78] sm:$0xff] %v343_v16 }

// kernel: graph_prompt_structure_forward.3
= control target key start
LH: loop header
LB: loop body
LE: loop exit
PB: predicated region body
PF: predicated region fallthrough
CT: control target
= control target key end

     0   :  { %s212_s1 = inlined_call_operand.vmem [shape: bf16[128,128], index: 1, kind: input, shape index: {}]   ;;  %s213_s2 = inlined_call_operand.vmem [shape: f32[1,128], index: 2, kind: input, shape index: {}]   ;;  %s214_s0 = inlined_call_operand.vmem [shape: bf16[16,128], index: 0, kind: input, shape index: {}]   ;;  %s215_s3 = inlined_call_operand.vmem [shape: f32[16,128], index: 3, kind: output, shape index: {}]  }
   0x1   :  { %v154_v0 = vld [vmem:[%s212_s1 + $0x38] sm:$0xff]  ;;  %v153_v1 = vld [vmem:[%s212_s1 + $0x30] sm:$0xff]  ;;  %v152_v2 = vld [vmem:[%s212_s1 + $0x28] sm:$0xff] }
   0x2   :  { %90 = vmatpush.bf16.msra.mxu0 %v154_v0  ;;  %v151_v3 = vld [vmem:[%s212_s1 + $0x20] sm:$0xff]  ;;  %v150_v4 = vld [vmem:[%s212_s1 + $0x18] sm:$0xff]  ;;  %v149_v5 = vld [vmem:[%s212_s1 + $0x10] sm:$0xff] }
   0x3   :  { %v148_v6 = vld [vmem:[%s212_s1 + $0x8] sm:$0xff]  ;;  %v147_v7 = vld [vmem:[%s212_s1] sm:$0xff] }
   0x4   :  { %v146_v8 = vld [vmem:[%s214_s0] sm:$0xff] }
   0x5   :  { %v155_v9 = vld [vmem:[%s213_s2] ss:$0 sm:$0xff] }
   0x6   :  { %91 = vmatpush.bf16.msra.mxu0 %v153_v1 }
   0xa   :  { %92 = vmatpush.bf16.msra.mxu0 %v152_v2 }
   0xe   :  { %93 = vmatpush.bf16.msra.mxu0 %v151_v3 }
  0x12   :  { %94 = vmatpush.bf16.msra.mxu0 %v150_v4 }
  0x16   :  { %95 = vmatpush.bf16.msra.mxu0 %v149_v5 }
  0x1a   :  { %96 = vmatpush.bf16.msra.mxu0 %v148_v6 }
  0x1e   :  { %97 = vmatpush.bf16.msra.mxu0 %v147_v7 }
  0x21   :  { %98 = vmatmul.bf16.vlgmr.msra.gmra.mxu0 %v146_v8 }
  0x9e   :  { %v99_v10 = vpop.f32.mrf.mxu0 }
  0x9f   :  { %v100_v11 = vadd.f32 %v155_v9, %v99_v10 }
  0xa1   :  { %104 = vst [vmem:[%s215_s3] sm:$0xff] %v100_v11 }
  0xa6   :  { %v101_v12 = vpop.f32.mrf.mxu0 }
  0xa7   :  { %v102_v13 = vadd.f32 %v155_v9, %v101_v12 }
  0xa9   :  { %105 = vst [vmem:[%s215_s3 + $0x8] sm:$0xff] %v102_v13 }

</bundles_post_ra>
